<compile_context>
chip_gen: v6e
topology: v6e:2x2x1
jax: 0.10.0
libtpu: 0.0.40
codegen_flags: <defaults>
</compile_context>

<pallas_src>
import math

import jax
import jax.numpy as jnp
from jax import lax
from jax.experimental import pallas as pl
from jax.experimental.pallas import tpu as pltpu

_NEG = -1e30


def _round_up(x, m):
    return ((x + m - 1) // m) * m


def _vmem_capacity_bytes():
    """Physical VMEM per core; conservative 64 MiB (v7x) fallback."""
    try:
        return int(pltpu.get_tpu_info().vmem_capacity_bytes)
    except Exception:
        return 64 * 1024 * 1024


# --------------------------------------------------------------------------
# Kernel factories
# --------------------------------------------------------------------------

def _make_flash_resident_kernel(*, causal, scale, tq, tk, has_bias):
    """K/V resident in VMEM; kv tiles iterated in-kernel. grid=(B, T/tq)."""

    def kernel(*refs):
        if has_bias:
            q_ref, k_ref, v_ref, bias_ref, o_ref, m_sc, l_sc, acc_sc, q_sc = refs
        else:
            q_ref, k_ref, v_ref, o_ref, m_sc, l_sc, acc_sc, q_sc = refs
            bias_ref = None

        qi = pl.program_id(1)
        n_kv_total = k_ref.shape[0]          # K/V reshaped to (n_kv, tk, E_pad)

        m_sc[...] = jnp.full_like(m_sc, _NEG)
        l_sc[...] = jnp.zeros_like(l_sc)
        acc_sc[...] = jnp.zeros_like(acc_sc)
        # fold 1/sqrt(E) into Q once per q tile (tq*E mults total)
        q_sc[...] = q_ref[...] * jnp.asarray(scale, dtype=q_sc.dtype)

        def step(ki, masked):
            k_tile = k_ref[ki]               # (tk, E_pad), leading-axis index
            v_tile = v_ref[ki]
            s = lax.dot_general(q_sc[...], k_tile, (((1,), (1,)), ((), ())),
                                preferred_element_type=jnp.float32)     # (tq, tk)
            if has_bias:
                s = s + bias_ref[ki]                                    # (1, tk)
            if masked:
                row = qi * tq + lax.broadcasted_iota(jnp.int32, (tq, tk), 0)
                col = ki * tk + lax.broadcasted_iota(jnp.int32, (tq, tk), 1)
                s = jnp.where(col > row, _NEG, s)
            m_prev = m_sc[...]
            m_new = jnp.maximum(m_prev, jnp.max(s, axis=-1, keepdims=True))
            alpha = jnp.exp(m_prev - m_new)
            p = jnp.exp(s - m_new)
            l_sc[...] = alpha * l_sc[...] + jnp.sum(p, axis=-1, keepdims=True)
            acc_sc[...] = alpha * acc_sc[...] + jnp.dot(
                p.astype(v_tile.dtype), v_tile, preferred_element_type=jnp.float32)
            m_sc[...] = m_new

        def unmasked_body(ki, carry):
            step(ki, False)
            return carry

        def masked_body(ki, carry):
            step(ki, True)
            return carry

        if causal:
            # tiles fully below the diagonal need no mask; tiles fully above
            # the diagonal are skipped entirely.
            n_full = jnp.minimum((qi * tq) // tk, n_kv_total)
            n_kv = jnp.minimum(((qi + 1) * tq + tk - 1) // tk, n_kv_total)
            lax.fori_loop(0, n_full, unmasked_body, 0)
            lax.fori_loop(n_full, n_kv, masked_body, 0)
        else:
            lax.fori_loop(0, n_kv_total, unmasked_body, 0)

        inv = pl.reciprocal(l_sc[...], approx=False)   # exact: keep 1e-5 accuracy
        o_ref[...] = (acc_sc[...] * inv).astype(o_ref.dtype)

    return kernel


def _make_flash_grid_kernel(*, causal, scale, tq, tk, has_bias):
    """Streamed online-softmax flash kernel. grid=(B, T/tq, S/tk)."""

    def kernel(*refs):
        if has_bias:
            q_ref, k_ref, v_ref, bias_ref, o_ref, m_sc, l_sc, acc_sc, q_sc = refs
        else:
            q_ref, k_ref, v_ref, o_ref, m_sc, l_sc, acc_sc, q_sc = refs
            bias_ref = None

        qi = pl.program_id(1)
        ki = pl.program_id(2)

        @pl.when(ki == 0)
        def _init():
            m_sc[...] = jnp.full_like(m_sc, _NEG)
            l_sc[...] = jnp.zeros_like(l_sc)
            acc_sc[...] = jnp.zeros_like(acc_sc)
            q_sc[...] = q_ref[...] * jnp.asarray(scale, dtype=q_sc.dtype)

        def _update(masked):
            s = lax.dot_general(q_sc[...], k_ref[...], (((1,), (1,)), ((), ())),
                                preferred_element_type=jnp.float32)     # (tq, tk)
            if has_bias:
                s = s + bias_ref[ki]                                    # (1, tk)
            if masked:
                row = qi * tq + lax.broadcasted_iota(jnp.int32, (tq, tk), 0)
                col = ki * tk + lax.broadcasted_iota(jnp.int32, (tq, tk), 1)
                s = jnp.where(col > row, _NEG, s)
            m_prev = m_sc[...]
            m_new = jnp.maximum(m_prev, jnp.max(s, axis=-1, keepdims=True))
            alpha = jnp.exp(m_prev - m_new)
            p = jnp.exp(s - m_new)
            l_sc[...] = alpha * l_sc[...] + jnp.sum(p, axis=-1, keepdims=True)
            acc_sc[...] = alpha * acc_sc[...] + jnp.dot(
                p.astype(v_ref.dtype), v_ref[...], preferred_element_type=jnp.float32)
            m_sc[...] = m_new

        if causal:
            contributes = ki * tk <= (qi + 1) * tq - 1       # any visible key
            straddles = (ki + 1) * tk - 1 > qi * tq          # crosses diagonal

            @pl.when(jnp.logical_and(contributes, straddles))
            def _masked():
                _update(True)

            @pl.when(jnp.logical_and(contributes, jnp.logical_not(straddles)))
            def _unmasked():
                _update(False)
        else:
            _update(False)

        @pl.when(ki == pl.num_programs(2) - 1)
        def _finalize():
            inv = pl.reciprocal(l_sc[...], approx=False)
            o_ref[...] = (acc_sc[...] * inv).astype(o_ref.dtype)

    return kernel


def _make_weights_kernel(*, causal, scale, tq, has_bias):
    """Row-block attention that also emits the (tq, S_pad) probability tile."""

    def kernel(*refs):
        if has_bias:
            q_ref, k_ref, v_ref, bias_ref, o_ref, w_ref = refs
        else:
            q_ref, k_ref, v_ref, o_ref, w_ref = refs
            bias_ref = None

        qi = pl.program_id(1)
        q = q_ref[...] * jnp.asarray(scale, dtype=q_ref.dtype)
        s = lax.dot_general(q, k_ref[...], (((1,), (1,)), ((), ())),
                            preferred_element_type=jnp.float32)         # (tq, S_pad)
        if has_bias:
            s = s + bias_ref[...]
        if causal:
            s_len = k_ref.shape[0]
            row = qi * tq + lax.broadcasted_iota(jnp.int32, (tq, s_len), 0)
            col = lax.broadcasted_iota(jnp.int32, (tq, s_len), 1)
            s = jnp.where(col > row, _NEG, s)
        m = jnp.max(s, axis=-1, keepdims=True)
        e = jnp.exp(s - m)
        denom = jnp.sum(e, axis=-1, keepdims=True)
        p = e * pl.reciprocal(denom, approx=False)
        o_ref[...] = jnp.dot(p.astype(v_ref.dtype), v_ref[...],
                             preferred_element_type=jnp.float32).astype(o_ref.dtype)
        w_ref[...] = p.astype(w_ref.dtype)

    return kernel


# --------------------------------------------------------------------------
# Wrapper
# --------------------------------------------------------------------------

def abstract_attention_forward(query, key, value, key_padding_mask=None,
                               causal=False, need_weights=True,
                               block_q=512, block_k=1024,
                               weights_dtype=jnp.float32,
                               kv_resident=None):
    """Pallas implementation of the (concrete) AbstractAttention forward contract.

    query: (B, T, E), key/value: (B, S, E), key_padding_mask: (B, S) int/bool
    (nonzero == padded / masked-out key position).
    Returns (attn_out (B, T, E), attn_weights (B, T, S) or None).
    kv_resident: None = auto (use the VMEM-resident K/V flash variant when it
    fits ~1/3 of VMEM), True/False = force.
    """
    B, T, E = query.shape
    Bk, S, Ek = key.shape
    assert Bk == B and Ek == E and value.shape == key.shape
    scale = 1.0 / math.sqrt(E)
    out_dtype = query.dtype

    block_q = _round_up(block_q, 8)
    block_k = _round_up(block_k, 128)

    # Lane-dense / MXU-friendly padding.
    E_pad = _round_up(E, 128)
    tq = min(block_q, _round_up(T, 8))          # multiple of 8 (sublane dim)
    T_pad = _round_up(T, tq)
    tk = min(block_k, _round_up(S, 128))        # multiple of 128 (lane dim)
    S_pad = _round_up(S, tk)
    n_kv = S_pad // tk

    def pad3(x, d1, d2):
        p1, p2 = d1 - x.shape[1], d2 - x.shape[2]
        return jnp.pad(x, ((0, 0), (0, p1), (0, p2))) if (p1 or p2) else x

    q_p = pad3(query, T_pad, E_pad)
    k_p = pad3(key, S_pad, E_pad)
    v_p = pad3(value, S_pad, E_pad)

    # key_padding_mask -> additive f32 bias (0 keep / -1e30 drop); keys added
    # by S-padding are dropped the same way.  Omitted entirely when unused.
    has_bias = (key_padding_mask is not None) or (S_pad > S)
    if has_bias:
        if key_padding_mask is None:
            bias_flat = jnp.zeros((B, S), jnp.float32)
        else:
            bias_flat = jnp.where(key_padding_mask.astype(bool), _NEG, 0.0
                                  ).astype(jnp.float32)
        if S_pad > S:
            bias_flat = jnp.pad(bias_flat, ((0, 0), (0, S_pad - S)),
                                constant_values=_NEG)
    else:
        bias_flat = None

    vmem_cap = _vmem_capacity_bytes()
    vmem_limit = int(vmem_cap * 0.75)           # leave compiler headroom (v7x!)

    # ---------------- need_weights=True: row-block kernel ----------------
    if need_weights:
        in_specs = [
            pl.BlockSpec((pl.Squeezed(), tq, E_pad), lambda b, qi: (b, qi, 0)),
            pl.BlockSpec((pl.Squeezed(), S_pad, E_pad), lambda b, qi: (b, 0, 0)),
            pl.BlockSpec((pl.Squeezed(), S_pad, E_pad), lambda b, qi: (b, 0, 0)),
        ]
        args = [q_p, k_p, v_p]
        if has_bias:
            in_specs.append(
                pl.BlockSpec((pl.Squeezed(), 1, S_pad), lambda b, qi: (b, 0, 0)))
            args.append(bias_flat[:, None, :])
        kernel = _make_weights_kernel(causal=causal, scale=scale, tq=tq,
                                      has_bias=has_bias)
        out, weights = pl.pallas_call(
            kernel,
            out_shape=(jax.ShapeDtypeStruct((B, T_pad, E_pad), out_dtype),
                       jax.ShapeDtypeStruct((B, T_pad, S_pad), weights_dtype)),
            grid_spec=pltpu.PrefetchScalarGridSpec(
                num_scalar_prefetch=0,
                grid=(B, T_pad // tq),
                in_specs=in_specs,
                out_specs=[
                    pl.BlockSpec((pl.Squeezed(), tq, E_pad), lambda b, qi: (b, qi, 0)),
                    pl.BlockSpec((pl.Squeezed(), tq, S_pad), lambda b, qi: (b, qi, 0)),
                ],
            ),
            compiler_params=pltpu.CompilerParams(
                dimension_semantics=("parallel", "parallel"),
                vmem_limit_bytes=vmem_limit),
        )(*args)
        return out[:, :T, :E], weights[:, :T, :S]

    # ---------------- need_weights=False: flash paths ----------------
    itemsize = jnp.dtype(key.dtype).itemsize
    kv_vmem_bytes = 2 * 2 * S_pad * E_pad * itemsize   # K+V, double-buffered
    if kv_resident is None:
        kv_resident = kv_vmem_bytes <= vmem_cap // 3

    scratch_shapes = [
        pltpu.VMEM((tq, 1), jnp.float32),       # running max m
        pltpu.VMEM((tq, 1), jnp.float32),       # running denom l
        pltpu.VMEM((tq, E_pad), jnp.float32),   # output accumulator
        pltpu.VMEM((tq, E_pad), query.dtype),   # pre-scaled Q
    ]

    if kv_resident:
        k_r = k_p.reshape(B, n_kv, tk, E_pad)
        v_r = v_p.reshape(B, n_kv, tk, E_pad)
        in_specs = [
            pl.BlockSpec((pl.Squeezed(), tq, E_pad), lambda b, qi: (b, qi, 0)),
            pl.BlockSpec((pl.Squeezed(), n_kv, tk, E_pad), lambda b, qi: (b, 0, 0, 0)),
            pl.BlockSpec((pl.Squeezed(), n_kv, tk, E_pad), lambda b, qi: (b, 0, 0, 0)),
        ]
        args = [q_p, k_r, v_r]
        if has_bias:
            in_specs.append(
                pl.BlockSpec((pl.Squeezed(), n_kv, 1, tk), lambda b, qi: (b, 0, 0, 0)))
            args.append(bias_flat.reshape(B, n_kv, 1, tk))
        kernel = _make_flash_resident_kernel(causal=causal, scale=scale,
                                             tq=tq, tk=tk, has_bias=has_bias)
        out = pl.pallas_call(
            kernel,
            out_shape=jax.ShapeDtypeStruct((B, T_pad, E_pad), out_dtype),
            grid_spec=pltpu.PrefetchScalarGridSpec(
                num_scalar_prefetch=0,
                grid=(B, T_pad // tq),
                in_specs=in_specs,
                out_specs=pl.BlockSpec((pl.Squeezed(), tq, E_pad),
                                       lambda b, qi: (b, qi, 0)),
                scratch_shapes=scratch_shapes,
            ),
            compiler_params=pltpu.CompilerParams(
                dimension_semantics=("parallel", "parallel"),
                vmem_limit_bytes=vmem_limit),
        )(*args)
        return out[:, :T, :E], None

    # Streamed fallback: grid kv axis.  Causal mode clamps the K/V index_map
    # so above-diagonal tiles are never re-DMA'd (compute is gated by pl.when).
    if causal:
        def kv_index_map(b, qi, ki):
            return (b, jnp.minimum(ki, ((qi + 1) * tq - 1) // tk), 0)
    else:
        def kv_index_map(b, qi, ki):
            return (b, ki, 0)

    in_specs = [
        pl.BlockSpec((pl.Squeezed(), tq, E_pad), lambda b, qi, ki: (b, qi, 0)),
        pl.BlockSpec((pl.Squeezed(), tk, E_pad), kv_index_map),
        pl.BlockSpec((pl.Squeezed(), tk, E_pad), kv_index_map),
    ]
    args = [q_p, k_p, v_p]
    if has_bias:
        # bias is fetched once per batch (constant block index across qi/ki)
        in_specs.append(
            pl.BlockSpec((pl.Squeezed(), n_kv, 1, tk), lambda b, qi, ki: (b, 0, 0, 0)))
        args.append(bias_flat.reshape(B, n_kv, 1, tk))
    kernel = _make_flash_grid_kernel(causal=causal, scale=scale,
                                     tq=tq, tk=tk, has_bias=has_bias)
    out = pl.pallas_call(
        kernel,
        out_shape=jax.ShapeDtypeStruct((B, T_pad, E_pad), out_dtype),
        grid_spec=pltpu.PrefetchScalarGridSpec(
            num_scalar_prefetch=0,
            grid=(B, T_pad // tq, n_kv),
            in_specs=in_specs,
            out_specs=pl.BlockSpec((pl.Squeezed(), tq, E_pad),
                                   lambda b, qi, ki: (b, qi, 0)),
            scratch_shapes=scratch_shapes,
        ),
        compiler_params=pltpu.CompilerParams(
            dimension_semantics=("parallel", "parallel", "arbitrary"),
            vmem_limit_bytes=vmem_limit),
    )(*args)
    return out[:, :T, :E], None


# --------------------------------------------------------------------------
# Pure-JAX reference + tests
# --------------------------------------------------------------------------

def _reference(query, key, value, key_padding_mask, causal):
    T = query.shape[1]
    S = key.shape[1]
    scale = 1.0 / math.sqrt(query.shape[-1])
    scores = jnp.einsum("bte,bse->bts", query, key) * scale
    if key_padding_mask is not None:
        scores = jnp.where(key_padding_mask[:, None, :].astype(bool), _NEG, scores)
    if causal:
        i = jnp.arange(T)[:, None]
        j = jnp.arange(S)[None, :]
        scores = jnp.where(j > i, _NEG, scores)
    p = jax.nn.softmax(scores, axis=-1)
    out = jnp.einsum("bts,bse->bte", p, value)
    return out, p


if __name__ == "__main__":
    def check(name, got, want, atol=1e-5):
        err = float(jnp.max(jnp.abs(got - want)))
        assert jnp.allclose(got, want, atol=atol, rtol=1e-5), f"{name}: max err {err}"

    # ---- case 1: tiny shapes, with key_padding_mask, all three kernels ----
    B, T, S, E = 2, 8, 8, 32
    kq, kk, kv = jax.random.split(jax.random.PRNGKey(0), 3)
    query = jax.random.normal(kq, (B, T, E), dtype=jnp.float32)
    key_ = jax.random.normal(kk, (B, S, E), dtype=jnp.float32)
    value = jax.random.normal(kv, (B, S, E), dtype=jnp.float32)
    kpm = jnp.zeros((B, S), dtype=jnp.int32).at[1, -2:].set(1)

    ref_out, ref_w = _reference(query, key_, value, kpm, causal=True)

    out_w, attn_w = abstract_attention_forward(
        query, key_, value, key_padding_mask=kpm, causal=True, need_weights=True)
    out_res, no_w = abstract_attention_forward(
        query, key_, value, key_padding_mask=kpm, causal=True, need_weights=False,
        kv_resident=True)
    out_grid, _ = abstract_attention_forward(
        query, key_, value, key_padding_mask=kpm, causal=True, need_weights=False,
        kv_resident=False)
    jax.block_until_ready((out_w, attn_w, out_res, out_grid))

    assert no_w is None
    check("c1 weights out", out_w, ref_out)
    check("c1 weights p", attn_w, ref_w)
    check("c1 flash resident", out_res, ref_out)
    check("c1 flash grid", out_grid, ref_out)

    # ---- case 2: multi-tile, padding + key_padding_mask ----
    B2, T2, S2, E2 = 2, 32, 192, 32
    kq2, kk2, kv2 = jax.random.split(jax.random.PRNGKey(1), 3)
    q2 = jax.random.normal(kq2, (B2, T2, E2), dtype=jnp.float32)
    k2 = jax.random.normal(kk2, (B2, S2, E2), dtype=jnp.float32)
    v2 = jax.random.normal(kv2, (B2, S2, E2), dtype=jnp.float32)
    kpm2 = jnp.zeros((B2, S2), dtype=jnp.int32).at[0, -7:].set(1)

    ref2_causal, _ = _reference(q2, k2, v2, kpm2, causal=True)
    ref2_full, ref2_w = _reference(q2, k2, v2, kpm2, causal=False)

    for resident in (True, False):
        oc, _ = abstract_attention_forward(
            q2, k2, v2, key_padding_mask=kpm2, causal=True, need_weights=False,
            block_q=16, block_k=128, kv_resident=resident)
        of, _ = abstract_attention_forward(
            q2, k2, v2, key_padding_mask=kpm2, causal=False, need_weights=False,
            block_q=16, block_k=128, kv_resident=resident)
        jax.block_until_ready((oc, of))
        check(f"c2 causal resident={resident}", oc, ref2_causal)
        check(f"c2 full resident={resident}", of, ref2_full)

    o2w, w2 = abstract_attention_forward(
        q2, k2, v2, key_padding_mask=kpm2, causal=False, need_weights=True,
        block_q=16, block_k=128)
    jax.block_until_ready((o2w, w2))
    check("c2 weights out", o2w, ref2_full)
    check("c2 weights p", w2, ref2_w)

    # ---- case 3: no mask, no padding (has_bias=False), unmasked+masked tiles ----
    B3, T3, S3, E3 = 2, 256, 256, 32
    kq3, kk3, kv3 = jax.random.split(jax.random.PRNGKey(2), 3)
    q3 = jax.random.normal(kq3, (B3, T3, E3), dtype=jnp.float32)
    k3 = jax.random.normal(kk3, (B3, S3, E3), dtype=jnp.float32)
    v3 = jax.random.normal(kv3, (B3, S3, E3), dtype=jnp.float32)

    ref3_causal, ref3_cw = _reference(q3, k3, v3, None, causal=True)
    ref3_full, _ = _reference(q3, k3, v3, None, causal=False)

    for resident in (True, False):
        oc, _ = abstract_attention_forward(
            q3, k3, v3, causal=True, need_weights=False,
            block_q=128, block_k=128, kv_resident=resident)
        of, _ = abstract_attention_forward(
            q3, k3, v3, causal=False, need_weights=False,
            block_q=128, block_k=128, kv_resident=resident)
        jax.block_until_ready((oc, of))
        check(f"c3 causal resident={resident}", oc, ref3_causal)
        check(f"c3 full resident={resident}", of, ref3_full)

    o3w, w3 = abstract_attention_forward(
        q3, k3, v3, causal=True, need_weights=True, block_q=128, block_k=128)
    jax.block_until_ready((o3w, w3))
    check("c3 weights out", o3w, ref3_causal)
    check("c3 weights p", w3, ref3_cw)

    print("KERNEL_OK")
</pallas_src>

<mosaic_0001>
module attributes {stable_mosaic.version = 11 : i64} {
  func.func @kernel(%arg0: i32, %arg1: i32, %arg2: memref<1x8x128xf32, #tpu.memory_space<vmem>>, %arg3: memref<1x128x128xf32, #tpu.memory_space<vmem>>, %arg4: memref<1x128x128xf32, #tpu.memory_space<vmem>>, %arg5: memref<1x1x128xf32, #tpu.memory_space<vmem>>, %arg6: memref<1x8x128xf32, #tpu.memory_space<vmem>>, %arg7: memref<1x8x128xf32, #tpu.memory_space<vmem>>) attributes {dimension_semantics = [#tpu.dimension_semantics<parallel>, #tpu.dimension_semantics<parallel>], iteration_bounds = array<i64: 2, 1>, scalar_prefetch = 0 : i64, scratch_operands = 0 : i64, tpu.core_type = #tpu.core_type<tc>, window_params = [{transform_indices = @transform_0, window_bounds = array<i64: 1, 8, 128>}, {transform_indices = @transform_1, window_bounds = array<i64: 1, 128, 128>}, {transform_indices = @transform_2, window_bounds = array<i64: 1, 128, 128>}, {transform_indices = @transform_3, window_bounds = array<i64: 1, 1, 128>}, {transform_indices = @transform_4, window_bounds = array<i64: 1, 8, 128>}, {transform_indices = @transform_5, window_bounds = array<i64: 1, 8, 128>}]} {
    %c0 = arith.constant 0 : index
    %c0_0 = arith.constant 0 : index
    %c0_1 = arith.constant 0 : index
    %0 = vector.load %arg2[%c0, %c0_0, %c0_1] : memref<1x8x128xf32, #tpu.memory_space<vmem>>, vector<1x8x128xf32>
    %1 = vector.shape_cast %0 : vector<1x8x128xf32> to vector<8x128xf32>
    %cst = arith.constant 0.176776692 : f32
    %2 = vector.broadcast %cst : f32 to vector<8x128xf32>
    %3 = arith.mulf %1, %2 : vector<8x128xf32>
    %c0_2 = arith.constant 0 : index
    %c0_3 = arith.constant 0 : index
    %c0_4 = arith.constant 0 : index
    %4 = vector.load %arg3[%c0_2, %c0_3, %c0_4] : memref<1x128x128xf32, #tpu.memory_space<vmem>>, vector<1x128x128xf32>
    %5 = vector.shape_cast %4 : vector<1x128x128xf32> to vector<128x128xf32>
    %cst_5 = arith.constant dense<0.000000e+00> : vector<8x128xf32>
    %6 = tpu.matmul %3, %5, %cst_5 {dimension_numbers = #tpu.dot_dimension_numbers<[1], [1], [0], [0], [0, 0, 1, 0], [], []>} : vector<8x128xf32>, vector<128x128xf32>, vector<8x128xf32> -> vector<8x128xf32>
    %c0_6 = arith.constant 0 : index
    %c0_7 = arith.constant 0 : index
    %c0_8 = arith.constant 0 : index
    %7 = vector.load %arg5[%c0_6, %c0_7, %c0_8] : memref<1x1x128xf32, #tpu.memory_space<vmem>>, vector<1x1x128xf32>
    %8 = vector.shape_cast %7 : vector<1x1x128xf32> to vector<1x128xf32>
    %9 = vector.broadcast %8 : vector<1x128xf32> to vector<8x128xf32>
    %10 = arith.addf %6, %9 : vector<8x128xf32>
    %c8_i32 = arith.constant 8 : i32
    %11 = arith.muli %arg1, %c8_i32 : i32
    %12 = tpu.iota {dimensions = array<i32: 0>} : vector<8x128xi32>
    %13 = vector.broadcast %11 : i32 to vector<8x128xi32>
    %14 = arith.addi %13, %12 : vector<8x128xi32>
    %15 = tpu.iota {dimensions = array<i32: 1>} : vector<8x128xi32>
    %16 = arith.cmpi sgt, %15, %14 : vector<8x128xi32>
    %cst_9 = arith.constant -1.000000e+30 : f32
    %17 = vector.broadcast %cst_9 : f32 to vector<8x128xf32>
    %18 = arith.select %16, %17, %10 : vector<8x128xi1>, vector<8x128xf32>
    %cst_10 = arith.constant dense<0xFF800000> : vector<8xf32>
    %19 = vector.multi_reduction <maximumf>, %18, %cst_10 [1] : vector<8x128xf32> to vector<8xf32>
    %20 = vector.shape_cast %19 : vector<8xf32> to vector<8x1xf32>
    %21 = vector.broadcast %20 : vector<8x1xf32> to vector<8x128xf32>
    %22 = arith.subf %18, %21 : vector<8x128xf32>
    %23 = math.exp %22 : vector<8x128xf32>
    %cst_11 = arith.constant dense<0.000000e+00> : vector<8xf32>
    %24 = vector.multi_reduction <add>, %23, %cst_11 [1] : vector<8x128xf32> to vector<8xf32>
    %25 = vector.shape_cast %24 : vector<8xf32> to vector<8x1xf32>
    %26 = tpu.reciprocal %25 : vector<8x1xf32> -> vector<8x1xf32>
    %27 = vector.broadcast %26 : vector<8x1xf32> to vector<8x128xf32>
    %28 = arith.mulf %23, %27 : vector<8x128xf32>
    %c0_12 = arith.constant 0 : index
    %c0_13 = arith.constant 0 : index
    %c0_14 = arith.constant 0 : index
    %29 = vector.load %arg4[%c0_12, %c0_13, %c0_14] : memref<1x128x128xf32, #tpu.memory_space<vmem>>, vector<1x128x128xf32>
    %30 = vector.shape_cast %29 : vector<1x128x128xf32> to vector<128x128xf32>
    %cst_15 = arith.constant dense<0.000000e+00> : vector<8x128xf32>
    %31 = tpu.matmul %28, %30, %cst_15 {dimension_numbers = #tpu.dot_dimension_numbers<[1], [0], [0], [1], [0, 0, 1, 1], [], []>} : vector<8x128xf32>, vector<128x128xf32>, vector<8x128xf32> -> vector<8x128xf32>
    %c0_16 = arith.constant 0 : index
    %c0_17 = arith.constant 0 : index
    %c0_18 = arith.constant 0 : index
    %32 = vector.load %arg6[%c0_16, %c0_17, %c0_18] : memref<1x8x128xf32, #tpu.memory_space<vmem>>, vector<1x8x128xf32>
    %33 = vector.shape_cast %32 : vector<1x8x128xf32> to vector<8x128xf32>
    %34 = vector.shape_cast %31 : vector<8x128xf32> to vector<1x8x128xf32>
    tpu.vector_store %arg6[%c0_16, %c0_17, %c0_18], %34 {strides = array<i32>} : memref<1x8x128xf32, #tpu.memory_space<vmem>>, vector<1x8x128xf32>,
    %c0_19 = arith.constant 0 : index
    %c0_20 = arith.constant 0 : index
    %c0_21 = arith.constant 0 : index
    %35 = vector.load %arg7[%c0_19, %c0_20, %c0_21] : memref<1x8x128xf32, #tpu.memory_space<vmem>>, vector<1x8x128xf32>
    %36 = vector.shape_cast %35 : vector<1x8x128xf32> to vector<8x128xf32>
    %37 = vector.shape_cast %28 : vector<8x128xf32> to vector<1x8x128xf32>
    tpu.vector_store %arg7[%c0_19, %c0_20, %c0_21], %37 {strides = array<i32>} : memref<1x8x128xf32, #tpu.memory_space<vmem>>, vector<1x8x128xf32>,
    return
  }
  func.func @transform_0(%arg0: i32, %arg1: i32) -> (i32, i32, i32) {
    %c0_i32 = arith.constant 0 : i32
    %c0_i32_0 = arith.constant 0 : i32
    return %arg0, %arg1, %c0_i32 : i32, i32, i32
  }
  func.func @transform_1(%arg0: i32, %arg1: i32) -> (i32, i32, i32) {
    %c0_i32 = arith.constant 0 : i32
    %c0_i32_0 = arith.constant 0 : i32
    %c0_i32_1 = arith.constant 0 : i32
    return %arg0, %c0_i32, %c0_i32_0 : i32, i32, i32
  }
  func.func @transform_2(%arg0: i32, %arg1: i32) -> (i32, i32, i32) {
    %c0_i32 = arith.constant 0 : i32
    %c0_i32_0 = arith.constant 0 : i32
    %c0_i32_1 = arith.constant 0 : i32
    return %arg0, %c0_i32, %c0_i32_0 : i32, i32, i32
  }
  func.func @transform_3(%arg0: i32, %arg1: i32) -> (i32, i32, i32) {
    %c0_i32 = arith.constant 0 : i32
    %c0_i32_0 = arith.constant 0 : i32
    %c0_i32_1 = arith.constant 0 : i32
    return %arg0, %c0_i32, %c0_i32_0 : i32, i32, i32
  }
  func.func @transform_4(%arg0: i32, %arg1: i32) -> (i32, i32, i32) {
    %c0_i32 = arith.constant 0 : i32
    %c0_i32_0 = arith.constant 0 : i32
    return %arg0, %arg1, %c0_i32 : i32, i32, i32
  }
  func.func @transform_5(%arg0: i32, %arg1: i32) -> (i32, i32, i32) {
    %c0_i32 = arith.constant 0 : i32
    %c0_i32_0 = arith.constant 0 : i32
    return %arg0, %arg1, %c0_i32 : i32, i32, i32
  }
}

</mosaic_0001>

<bundles_post_ra>
// kernel: tpu_custom_call.1
= control target key start
LH: loop header
LB: loop body
LE: loop exit
PB: predicated region body
PF: predicated region fallthrough
CT: control target
= control target key end

     0   :  { %s1529_s0 = inlined_call_operand.hbm [shape: f32[2,8,128], index: 0, kind: input, shape index: {}]   ;;  %s1530_s1 = inlined_call_operand.hbm [shape: f32[2,128,128], index: 1, kind: input, shape index: {}]   ;;  %s1531_s2 = inlined_call_operand.hbm [shape: f32[2,128,128], index: 2, kind: input, shape index: {}]   ;;  %s1532_s3 = inlined_call_operand.vmem [shape: f32[2,1,128], index: 3, kind: input, shape index: {}]   ;;  %s1533_s4 = inlined_call_operand.hbm [shape: f32[2,8,128], index: 4, kind: output, shape index: {0}]   ;;  %s1534_s5 = inlined_call_operand.hbm [shape: f32[2,8,128], index: 5, kind: output, shape index: {1}]  }
   0x1   :  { %1540 = sst [smem:[#allocation20_spill]] %s1530_s1 }
   0x2   :  { %11 = vsyncpa [#allocation3], 0 }
   0x3   :  { %13 = vsyncpa [#allocation3 + $0x1], 0 }
   0x4   :  { %14 = vsyncpa [#allocation6], 0 }
   0x5   :  { %16 = vsyncpa [#allocation6 + $0x1], 0 }
   0x6   :  { %17 = vsyncpa [#allocation4], 0 }
   0x7   :  { %19 = vsyncpa [#allocation4 + $0x1], 0 }
   0x8   :  { %20 = vsyncpa [#allocation10], 0 }
   0x9   :  { %22 = vsyncpa [#allocation10 + $0x1], 0  ;;  %s1216_s18 = smov 0   ;;  %s1218_s19 = smov 0  }
   0xa   :  { %s1220_s20 = smov 0   ;;  %s1222_s21 = smov 0  }
   0xb   :  { %s1224_s22 = smov 0   ;;  %s1226_s23 = smov 0  }
   0xc LB: > { %1541 = sst [smem:[#allocation15_spill]] %s1155_s18  ;;  %s1247_s24 = sadd.s32 4294967295, %s1175_s23   ;;  %s1175_s23 = sphi %s1226_s23, %s28_s23   ;;  %s1171_s22 = sphi %s1224_s22, %s1563_s22   ;;  %s1167_s21 = sphi %s1222_s21, %s1562_s21   ;;  %s1163_s20 = sphi %s1220_s20, %s1558_s20   ;;  %s1159_s19 = sphi %s1218_s19, %s1561_s19   ;;  %s1155_s18 = sphi %s1216_s18, %s1560_s18  }
   0xd   : > { %1542 = sst [smem:[#allocation16_spill]] %s1163_s20  ;;  %s762_s25 = sadd.s32 4294967294, %s1175_s23  }
   0xe   : > { %s40_s26 = sadd.s32 1, %s1171_s22  ;;  %s49_s27 = sadd.s32 1, %s1163_s20 }
   0xf   : > { %p42_p0 = scmp.ge.s32.totalorder %s40_s26, 2  ;;  %p56_p1 = scmp.ne.s32.totalorder %s1163_s20, %s1159_s19 }
  0x10   : > { %p57_p2 = scmp.eq.s32.totalorder %s1175_s23, 0  ;;  %p62_p3 = scmp.ne.s32.totalorder %s1159_s19, %s1155_s18 }
  0x11   : > { %s1565_s26 = smov (%p42_p0, %s40_s26), 0  ;;  %p63_p5 = scmp.eq.s32.totalorder %s1247_s24, 0 }
  0x12   : > { %1543 = sst [smem:[#allocation17_spill]] %s1565_s26  ;;  %p1259_p4 = por %p57_p2, %p56_p1 }
  0x13   : > { %s44_s29 = ssub.s32 %s1171_s22, %s1565_s26  ;;  %p166_p6 = scmp.eq.s32.totalorder %s1247_s24, 1 }
  0x14   : > { %p47_p7 = scmp.eq.s32.totalorder %s44_s29, 0  ;;  %p1267_p8 = por %p63_p5, %p62_p3 }
  0x15   : > { %p1271_p9 = por %p166_p6, %p56_p1  ;;  %p172_p10 = scmp.eq.s32.totalorder %s762_s25, 1 }
  0x16   : > { %s1276_s7 = scalar_select %p47_p7, %s1163_s20, %s49_s27  }
  0x17   : > { %p1278_p11 = por %p172_p10, %p62_p3  ;;  %p919_p13 = scmp.lt.s32.totalorder %s1175_s23, 2 }
  0x18   : > { %1547 = sst [smem:[#allocation18_spill]] %s1276_s7  ;;  %s1285_s9 = sand.u32 1, %s1163_s20  }
  0x19   : > { %s1548_s8 = scalar_select %p1278_p11, 1, 0 }
  0x1a   : > { %s239_s10 = sand.u32 1, %s1175_s23   ;;  %s767_s11 = sshll.u32 %s1285_s9, 7 }
  0x1b   : > { %1549 = sst [smem:[#allocation19_spill]] %s1548_s8  ;;  %p1291_p0 = pnand %p919_p13, %p1259_p4 }
  0x1c   : > { %s786_s13 = sshll.u32 %s1171_s22, 11  ;;  %s1551_s1 = sld [smem:[#allocation20_spill]] }
  0x1d   : > { %s243_s17 = scalar_lea.vmem [#allocation5], %s767_s11  ;;  %s1301_s27 = scalar_lea.sflag [#allocation6], %s239_s10 }
  0x1e   : > { %s250_s25 = sshll.u32 %s243_s17, 4  ;;  %p979_p1 = pneg %p1291_p0  ;;  %s251_s25 = int_to_ptr.vmem [resolvable:$true] %s250_s25 }
  0x1f   : > { %s990_s28 = scalar_lea.vmem %s251_s25, 2048  ;;  %s1177_s29 = smov [#allocation5]  }
  0x20   : > { %p991_p2 = scmp.ne.s32.totalorder %s251_s25, %s990_s28  ;;  %s995_s26 = sshll.u32 %s1177_s29, 4  ;;  %s996_s26 = int_to_ptr.vmem [resolvable:$false] %s995_s26 }
  0x21   : > { %s997_s7 = scalar_lea.vmem %s996_s26, 4096  ;;  %p998_p5 = scmp.lt.s32.totalorder %s251_s25, %s996_s26 }
  0x22   : > { %s249_s16 = scalar_lea.hbm %s1551_s1, %s786_s13  ;;  %p993_p3 = pnand %p991_p2, %p979_p1 }
  0x23   : > { %p999_p6 = scmp.lt.s32.totalorder %s997_s7, %s990_s28 }
  0x24   : > { %p994_p4 = pneg %p993_p3 }
  0x25   : > { %p1000_p7 = por %p999_p6, %p998_p5 }
  0x27   : > { %p1001_p10 = pnand %p1000_p7, %p994_p4 }
  0x29   : > { %1004 = shalt.err (!%p1001_p10)
}
  0x2a   : > { %s1539_s14 = smov 128   ;;  %s1179_s10 = smov 8  }
  0x2b   : > { %908 = dma.hbm_to_vmem [thread:$0]  (!%p1291_p0), %s249_s16, 2048, %s251_s25, %s1301_s27, %s1539_s14, %s1539_s14, %s1179_s10  }
  0x2c   : > { %s1317_s15 = scalar_lea.hbm %s1531_s2, %s786_s13  ;;  %p773_p13 = scmp.ge.s32.totalorder %s1175_s23, 1 }
  0x2d   : > { %s264_s17 = scalar_lea.vmem [#allocation7], %s767_s11  ;;  %p285_p2 = scmp.lt.s32.totalorder %s1175_s23, 3 }
  0x2e   : > { %s271_s28 = sshll.u32 %s264_s17, 4  ;;  %s765_s1 = sshll.u32 %s1285_s9, 3  ;;  %s1332_s28 = int_to_ptr.vmem [resolvable:$true] %s271_s28 }
  0x2f   : > { %p1323_p3 = pnand %p773_p13, %p285_p2  ;;  %s766_s20 = sshll.u32 %s1171_s22, 7 }
  0x30   : > { %s230_s16 = scalar_lea.hbm %s1529_s0, %s766_s20  ;;  %s224_s13 = scalar_lea.vmem [#allocation2], %s765_s1 }
  0x31   : > { %s232_s25 = sshll.u32 %s224_s13, 4  ;;  %s221_s26 = scalar_lea.sflag [#allocation3], %s1285_s9  ;;  %s233_s25 = int_to_ptr.vmem [resolvable:$true] %s232_s25 }
  0x32   : > { %s1018_s7 = scalar_lea.vmem %s233_s25, 128  ;;  %s1180_s11 = smov [#allocation2]  }
  0x33   : > { %p1019_p4 = scmp.ne.s32.totalorder %s233_s25, %s1018_s7  ;;  %s1023_s17 = sshll.u32 %s1180_s11, 4  ;;  %s1024_s17 = int_to_ptr.vmem [resolvable:$false] %s1023_s17 }
  0x34   : > { %s1025_s14 = scalar_lea.vmem %s1024_s17, 256  ;;  %p1026_p7 = scmp.lt.s32.totalorder %s233_s25, %s1024_s17 }
  0x35   : > { %p1021_p5 = pnand %p1019_p4, %p979_p1  ;;  %p1027_p10 = scmp.lt.s32.totalorder %s1025_s14, %s1018_s7 }
  0x37   : > { %p1022_p6 = pneg %p1021_p5  ;;  %p1028_p13 = por %p1027_p10, %p1026_p7 }
  0x39   : > { %p1029_p2 = pnand %p1028_p13, %p1022_p6 }
  0x3b   : > { %1032 = shalt.err (!%p1029_p2)
}
  0x3c   : > { %905 = dma.hbm_to_vmem [thread:$0]  (!%p1291_p0), %s230_s16, 128, %s233_s25, %s221_s26  }
  0x3d   : > { %s1046_s1 = scalar_lea.vmem %s1332_s28, 2048  ;;  %s1181_s18 = smov [#allocation7]  }
  0x3e   : > { %p1047_p12 = scmp.ne.s32.totalorder %s1332_s28, %s1046_s1  ;;  %s1051_s20 = sshll.u32 %s1181_s18, 4  ;;  %s1052_s20 = int_to_ptr.vmem [resolvable:$false] %s1051_s20 }
  0x3f   : > { %s1053_s8 = scalar_lea.vmem %s1052_s20, 4096  ;;  %p1054_p7 = scmp.lt.s32.totalorder %s1332_s28, %s1052_s20 }
  0x40   : > { %p1049_p4 = pnand %p1047_p12, %p979_p1  ;;  %p1055_p6 = scmp.lt.s32.totalorder %s1053_s8, %s1046_s1 }
  0x42   : > { %p1050_p5 = pneg %p1049_p4  ;;  %p1056_p10 = por %p1055_p6, %p1054_p7 }
  0x44   : > { %p1057_p13 = pnand %p1056_p10, %p1050_p5 }
  0x46   : > { %1060 = shalt.err (!%p1057_p13)
}
  0x47   : > { %s1553_s9 = smov 128   ;;  %289 = sbr.rel (%p1323_p3) target bundleno = 859 (0x35b), region = 36 }
  0x48   : > { %911 = dma.hbm_to_vmem [thread:$0]  (!%p1291_p0), %s1317_s15, 2048, %s1332_s28, %s1301_s27, %s1553_s9, %s1553_s9, %s1179_s10  }
  0x49   : > { %s1357_s14 = sand.u32 (!%p1323_p3), 1, %s1159_s19  }
  0x4a   : > { %s1360_s16 = sshll.u32 (!%p1323_p3), %s1357_s14, 3  ;;  %s292_s12 = scalar_lea.sflag (!%p1323_p3), [#allocation3], %s1357_s14 }
  0x4b   : > { %s295_s13 = scalar_lea.vmem (!%p1323_p3), [#allocation2], %s1360_s16 }
  0x4c   : > { %1138 = dma.done.wait (%p1267_p8), %s292_s12, 128  }
  0x4d   : > { %1140 = vsyncadd (%p1267_p8), %s292_s12, 4294967168  ;;  %s300_s27 = sand.u32 1, %s1247_s24   ;;  %s775_s10 = sshll.u32 %s1357_s14, 7 }
  0x4e   : > { %s301_s15 = scalar_lea.sflag [#allocation6], %s300_s27  ;;  %s1372_s28 = scalar_lea.vmem [#allocation5], %s775_s10 }
  0x4f   : > { %1142 = dma.done.wait (%p1267_p8), %s301_s15, 4096  }
  0x50   : > { %1144 = vsyncadd (%p1267_p8), %s301_s15, 4294963200  ;;  %v1182_v0 = vmov 0.0   ;;  %vm1183_vm0 = vmmov 0   ;;  %v378_v1 = vld [vmem:[%s1372_s28 + $0x78] sm:$0xff]  ;;  %v377_v2 = vld [vmem:[%s1372_s28 + $0x70] sm:$0xff]  ;;  %p358_p8 = scmp.lt.s32.totalorder %s1167_s21, 1  ;;  %v457_v19 = vlaneseq }
  0x51   : > { %822 = vmatprep.subr.mxu0 %v1182_v0  ;;  %854 = vmatprep.mubr.msk.f32.mxu0 %vm1183_vm0, %v1182_v0  ;;  %v376_v3 = vld [vmem:[%s1372_s28 + $0x68] sm:$0xff]  ;;  %v375_v4 = vld [vmem:[%s1372_s28 + $0x60] sm:$0xff]  ;;  %v374_v5 = vld [vmem:[%s1372_s28 + $0x58] sm:$0xff]  ;;  %s1422_s26 = scalar_lea.vmem [#allocation7], %s775_s10  ;;  %s357_s7 = scalar_lea.vmem [#allocation9], %s1360_s16 }
  0x52   : > { %857 = vmatprep.subr.mxu1 %v1182_v0  ;;  %889 = vmatprep.mubr.msk.f32.mxu1 %vm1183_vm0, %v1182_v0  ;;  %v373_v6 = vld [vmem:[%s1372_s28 + $0x50] sm:$0xff]  ;;  %v372_v7 = vld [vmem:[%s1372_s28 + $0x48] sm:$0xff]  ;;  %v371_v8 = vld [vmem:[%s1372_s28 + $0x40] sm:$0xff]  ;;  %s359_s24 = scalar_select %p358_p8, %s1167_s21, 1  ;;  %v458_v20 = vshrl.u32 %v457_v19, 7  ;;  %v462_v21 = vand.u32 127, %v457_v19 }
  0x53   : > { %823 = vmatpush3.xpose.msra.mxu0 %v378_v1  ;;  %v370_v9 = vld [vmem:[%s1372_s28 + $0x38] sm:$0xff]  ;;  %v369_v10 = vld [vmem:[%s1372_s28 + $0x30] sm:$0xff]  ;;  %v368_v11 = vld [vmem:[%s1372_s28 + $0x28] sm:$0xff]  ;;  %s782_s11 = sshll.u32 %s1167_s21, 7  ;;  %s596_s20 = sshll.u32 %s357_s7, 4  ;;  %s597_s20 = int_to_ptr.vmem [resolvable:$true] %s596_s20 }
  0x54   : > { %824 = vmatprep.subr.mxu0 %v1182_v0  ;;  %v367_v12 = vld [vmem:[%s1372_s28 + $0x20] sm:$0xff]  ;;  %v366_v13 = vld [vmem:[%s1372_s28 + $0x18] sm:$0xff]  ;;  %v365_v14 = vld [vmem:[%s1372_s28 + $0x10] sm:$0xff]  ;;  %s360_s25 = scalar_lea.vmem %s1532_s3, %s359_s24  ;;  %vm463_vm1 = vcmp.gt.s32.totalorder %v462_v21, %v458_v20  ;;  %s594_s18 = scalar_lea.hbm %s1534_s5, %s782_s11 }
  0x55   : > { %v364_v15 = vld [vmem:[%s1372_s28 + $0x8] sm:$0xff]  ;;  %v361_v16 = vld [vmem:[%s295_s13] sm:$0xff]  ;;  %v363_v17 = vld [vmem:[%s1372_s28] sm:$0xff]  ;;  %s568_s8 = scalar_lea.sflag [#allocation10], %s1357_s14  ;;  %s1061_s9 = scalar_lea.vmem %s597_s20, 128 }
  0x56   : > { %v362_v18 = vmul.f32 0.17677669, %v361_v16  ;;  %v779_v22 = vld [vmem:[%s360_s25] ss:$0 sm:$0xff]  ;;  %v489_v27 = vld [vmem:[%s1422_s26 + $0x78] sm:$0xff]  ;;  %v487_v29 = vld [vmem:[%s1422_s26 + $0x68] sm:$0xff]  ;;  %p1062_p12 = scmp.ne.s32.totalorder %s597_s20, %s1061_s9 }
  0x57   : > { %825 = vmatpush3.xpose.msra.mxu0 %v377_v2  ;;  %v488_v28 = vld [vmem:[%s1422_s26 + $0x70] sm:$0xff]  ;;  %858 = vmatpush3.msra.mxu1 %v489_v27  ;;  %v486_v30 = vld [vmem:[%s1422_s26 + $0x60] sm:$0xff]  ;;  %v485_v31 = vld [vmem:[%s1422_s26 + $0x58] sm:$0xff]  ;;  %s1184_s12 = smov [#allocation9]  }
  0x58   : > { %826 = vmatprep.subr.mxu0 %v1182_v0  ;;  %859 = vmatprep.subr.mxu1 %v1182_v0  ;;  %v484_v32 = vld [vmem:[%s1422_s26 + $0x50] sm:$0xff]  ;;  %v483_v33 = vld [vmem:[%s1422_s26 + $0x48] sm:$0xff]  ;;  %v482_v34 = vld [vmem:[%s1422_s26 + $0x40] sm:$0xff]  ;;  %p1063_p0 = pnand %p1062_p12, %p1271_p9  ;;  %s1065_s13 = sshll.u32 %s1184_s12, 4  ;;  %s1066_s13 = int_to_ptr.vmem [resolvable:$false] %s1065_s13 }
  0x59   : > { %860 = vmatpush3.msra.mxu1 %v488_v28  ;;  %v481_v39 = vld [vmem:[%s1422_s26 + $0x38] sm:$0xff]  ;;  %v480_v40 = vld [vmem:[%s1422_s26 + $0x30] sm:$0xff]  ;;  %v479_v41 = vld [vmem:[%s1422_s26 + $0x28] sm:$0xff]  ;;  %s1067_s27 = scalar_lea.vmem %s1066_s13, 256  ;;  %p1068_p3 = scmp.lt.s32.totalorder %s597_s20, %s1066_s13 }
  0x5a   : > { %861 = vmatprep.subr.mxu1 %v1182_v0  ;;  %v478_v42 = vld [vmem:[%s1422_s26 + $0x20] sm:$0xff]  ;;  %v477_v43 = vld [vmem:[%s1422_s26 + $0x18] sm:$0xff]  ;;  %v476_v44 = vld [vmem:[%s1422_s26 + $0x10] sm:$0xff]  ;;  %p1064_p1 = pneg %p1063_p0  ;;  %p1069_p2 = scmp.lt.s32.totalorder %s1067_s27, %s1061_s9 }
  0x5b   : > { %827 = vmatpush3.xpose.msra.mxu0 %v376_v3  ;;  %862 = vmatpush3.msra.mxu1 %v487_v29  ;;  %v475_v45 = vld [vmem:[%s1422_s26 + $0x8] sm:$0xff]  ;;  %v474_v46 = vld [vmem:[%s1422_s26] sm:$0xff] }
  0x5c   : > { %828 = vmatprep.subr.mxu0 %v1182_v0  ;;  %863 = vmatprep.subr.mxu1 %v1182_v0  ;;  %p1070_p4 = por %p1069_p2, %p1068_p3 }
  0x5d   : > { %864 = vmatpush3.msra.mxu1 %v486_v30 }
  0x5e   : > { %865 = vmatprep.subr.mxu1 %v1182_v0  ;;  %p1071_p5 = pnand %p1070_p4, %p1064_p1 }
  0x5f   : > { %829 = vmatpush3.xpose.msra.mxu0 %v375_v4  ;;  %866 = vmatpush3.msra.mxu1 %v485_v31 }
  0x60   : > { %830 = vmatprep.subr.mxu0 %v1182_v0  ;;  %867 = vmatprep.subr.mxu1 %v1182_v0 }
  0x61   : > { %868 = vmatpush3.msra.mxu1 %v484_v32 }
  0x62   : > { %869 = vmatprep.subr.mxu1 %v1182_v0 }
  0x63   : > { %831 = vmatpush3.xpose.msra.mxu0 %v374_v5  ;;  %870 = vmatpush3.msra.mxu1 %v483_v33 }
  0x64   : > { %832 = vmatprep.subr.mxu0 %v1182_v0  ;;  %871 = vmatprep.subr.mxu1 %v1182_v0 }
  0x65   : > { %872 = vmatpush3.msra.mxu1 %v482_v34 }
  0x66   : > { %873 = vmatprep.subr.mxu1 %v1182_v0 }
  0x67   : > { %833 = vmatpush3.xpose.msra.mxu0 %v373_v6  ;;  %874 = vmatpush3.msra.mxu1 %v481_v39 }
  0x68   : > { %834 = vmatprep.subr.mxu0 %v1182_v0  ;;  %875 = vmatprep.subr.mxu1 %v1182_v0 }
  0x69   : > { %876 = vmatpush3.msra.mxu1 %v480_v40 }
  0x6a   : > { %877 = vmatprep.subr.mxu1 %v1182_v0 }
  0x6b   : > { %835 = vmatpush3.xpose.msra.mxu0 %v372_v7  ;;  %878 = vmatpush3.msra.mxu1 %v479_v41 }
  0x6c   : > { %836 = vmatprep.subr.mxu0 %v1182_v0  ;;  %879 = vmatprep.subr.mxu1 %v1182_v0 }
  0x6d   : > { %880 = vmatpush3.msra.mxu1 %v478_v42 }
  0x6e   : > { %881 = vmatprep.subr.mxu1 %v1182_v0 }
  0x6f   : > { %837 = vmatpush3.xpose.msra.mxu0 %v371_v8  ;;  %882 = vmatpush3.msra.mxu1 %v477_v43 }
  0x70   : > { %838 = vmatprep.subr.mxu0 %v1182_v0  ;;  %883 = vmatprep.subr.mxu1 %v1182_v0 }
  0x71   : > { %884 = vmatpush3.msra.mxu1 %v476_v44 }
  0x72   : > { %885 = vmatprep.subr.mxu1 %v1182_v0 }
  0x73   : > { %839 = vmatpush3.xpose.msra.mxu0 %v370_v9  ;;  %886 = vmatpush3.msra.mxu1 %v475_v45 }
  0x74   : > { %840 = vmatprep.subr.mxu0 %v1182_v0  ;;  %887 = vmatprep.subr.mxu1 %v1182_v0 }
  0x75   : > { %888 = vmatpush3.msra.mxu1 %v474_v46 }
  0x77   : > { %841 = vmatpush3.xpose.msra.mxu0 %v369_v10 }
  0x78   : > { %842 = vmatprep.subr.mxu0 %v1182_v0 }
  0x7b   : > { %843 = vmatpush3.xpose.msra.mxu0 %v368_v11 }
  0x7c   : > { %844 = vmatprep.subr.mxu0 %v1182_v0 }
  0x7f   : > { %845 = vmatpush3.xpose.msra.mxu0 %v367_v12 }
  0x80   : > { %846 = vmatprep.subr.mxu0 %v1182_v0 }
  0x83   : > { %847 = vmatpush3.xpose.msra.mxu0 %v366_v13 }
  0x84   : > { %848 = vmatprep.subr.mxu0 %v1182_v0 }
  0x87   : > { %849 = vmatpush3.xpose.msra.mxu0 %v365_v14 }
  0x88   : > { %850 = vmatprep.subr.mxu0 %v1182_v0 }
  0x8b   : > { %851 = vmatpush3.xpose.msra.mxu0 %v364_v15 }
  0x8c   : > { %852 = vmatprep.subr.mxu0 %v1182_v0 }
  0x8f   : > { %853 = vmatpush3.xpose.msra.mxu0 %v363_v17 }
  0x92   : > { %855 = vmatmul.mubr.f32.vlgmr.msra.gmra.mxu0 %v362_v18 }
 0x152   : > { %v452_v23 = vpop.f32.mrf.mxu0 }
 0x153   : > { %v453_v24 = vadd.f32 %v779_v22, %v452_v23 }
 0x154   : > { %v856_v25 = vpop.f32.mrf.mxu0 }
 0x155   : > { %v464_v26 = vsel %vm463_vm1, -1e+30, %v453_v24 }
 0x156   : > { %465 = vmax.xlane.f32.xlu0 %v464_v26 }
 0x1df   : > { %v466_v35 = vpop.xlane.xlu0 %465 }
 0x1e0   : > { %v467_v36 = vsub.f32 %v464_v26, %v466_v35 }
 0x1e2   : > { %v468_v37 = vmul.f32 1.442695, %v467_v36 }
 0x1e4   : > { %973 = vpow2.f32 %v468_v37 }
 0x1f1   : > { %v974_v38 = vpop.eup %973 }
 0x1f2   : > { %470 = vadd.xlane.f32.xlu0 %v974_v38 }
 0x27b   : > { %v471_v47 = vpop.xlane.xlu0 %470 }
 0x27c   : > { %975 = vrcp.f32 %v471_v47 }
 0x289   : > { %v976_v48 = vpop.eup %975 }
 0x28a   : > { %v473_v49 = vmul.f32 %v976_v48, %v974_v38 }
 0x28c   : > { %890 = vmatmul.mubr.f32.vlgmr.msra.gmra.mxu1 %v473_v49  ;;  %561 = vst [vmem:[%s357_s7] sm:$0xff] %v473_v49 }
 0x28d   : > { %1074 = shalt.err (!%p1071_p5)
}
 0x28e   : > { %s1075_s10 = scalar_lea.hbm %s594_s18, 128  ;;  %s1079_s24 = scalar_lea.hbm %s1534_s5, 256 }
 0x28f   : > { %p1076_p7 = scmp.ne.s32.totalorder %s594_s18, %s1075_s10  ;;  %p1080_p13 = scmp.lt.s32.totalorder %s594_s18, %s1534_s5 }
 0x290   : > { %p1081_p8 = scmp.lt.s32.totalorder %s1079_s24, %s1075_s10 }
 0x291   : > { %p1077_p6 = pnand %p1076_p7, %p1271_p9 }
 0x292   : > { %p1082_p12 = por %p1081_p8, %p1080_p13 }
 0x293   : > { %p1078_p10 = pneg %p1077_p6 }
 0x295   : > { %p1083_p0 = pnand %p1082_p12, %p1078_p10 }
 0x297   : > { %1086 = shalt.err (!%p1083_p0)
}
 0x298   : > { %899 = dma.vmem_to_hbm [thread:$0]  (%p1271_p9), %s597_s20, 128, %s594_s18, %s568_s8  }
 0x299   : > { %s350_s25 = scalar_lea.vmem [#allocation8], %s1360_s16  ;;  %s1483_s1 = scalar_lea.hbm %s1533_s4, %s782_s11 }
 0x29a   : > { %s582_s26 = sshll.u32 %s350_s25, 4  ;;  %s563_s9 = scalar_lea.sflag [#allocation4], %s1357_s14  ;;  %s1476_s26 = int_to_ptr.vmem [resolvable:$true] %s582_s26 }
 0x29b   : > { %s1087_s12 = scalar_lea.vmem %s1476_s26, 128  ;;  %s1185_s16 = smov [#allocation8]  }
 0x29c   : > { %p1088_p1 = scmp.ne.s32.totalorder %s1476_s26, %s1087_s12  ;;  %s1091_s18 = sshll.u32 %s1185_s16, 4  ;;  %s1092_s18 = int_to_ptr.vmem [resolvable:$false] %s1091_s18 }
 0x29d   : > { %s1093_s21 = scalar_lea.vmem %s1092_s18, 256  ;;  %p1094_p4 = scmp.lt.s32.totalorder %s1476_s26, %s1092_s18 }
 0x29e   : > { %p1089_p3 = pnand %p1088_p1, %p1271_p9  ;;  %p1095_p5 = scmp.lt.s32.totalorder %s1093_s21, %s1087_s12 }
 0x2a0   : > { %p1090_p2 = pneg %p1089_p3  ;;  %p1096_p7 = por %p1095_p5, %p1094_p4 }
 0x2a2   : > { %p1097_p6 = pnand %p1096_p7, %p1090_p2 }
 0x34c   : > { %v556_v50 = vpop.f32.mrf.mxu1 }
 0x34d   : > { %560 = vst [vmem:[%s350_s25] sm:$0xff] %v556_v50 }
 0x34e   : > { %v891_v51 = vpop.f32.mrf.mxu1 }
 0x34f   : > { %1100 = shalt.err (!%p1097_p6)
}
 0x350   : > { %s1101_s11 = scalar_lea.hbm %s1483_s1, 128  ;;  %s1105_s8 = scalar_lea.hbm %s1533_s4, 256 }
 0x351   : > { %p1102_p10 = scmp.ne.s32.totalorder %s1483_s1, %s1101_s11  ;;  %p1106_p12 = scmp.lt.s32.totalorder %s1483_s1, %s1533_s4 }
 0x352   : > { %p1107_p0 = scmp.lt.s32.totalorder %s1105_s8, %s1101_s11 }
 0x353   : > { %p1103_p13 = pnand %p1102_p10, %p1271_p9 }
 0x354   : > { %p1108_p1 = por %p1107_p0, %p1106_p12 }
 0x355   : > { %p1104_p8 = pneg %p1103_p13 }
 0x357   : > { %p1109_p3 = pnand %p1108_p1, %p1104_p8 }
 0x359   : > { %1112 = shalt.err (!%p1109_p3)
}
 0x35a   : > { %898 = dma.vmem_to_hbm [thread:$0]  (%p1271_p9), %s1476_s26, 128, %s1483_s1, %s563_s9  }
 0x35b PF: > { %s1554_s10 = sld [smem:[#allocation15_spill]]  ;;  %p1556_p2 = scmp.ge.s32.totalorder %s1175_s23, 2 }
 0x35d   : > { %p913_p4 = pnand %p1556_p2, %p1278_p11 }
 0x35f   : > { %p914_p5 = pneg %p913_p4 }
 0x361   : > { %s608_s28 = sand.u32 1, %s1554_s10  }
 0x362   : > { %s609_s24 = scalar_lea.sflag [#allocation4], %s608_s28 }
 0x363   : > { %1146 = dma.done.wait (%p914_p5), %s609_s24, 128  }
 0x364   : > { %1148 = vsyncadd (%p914_p5), %s609_s24, 4294967168  ;;  %s618_s30 = scalar_lea.sflag [#allocation10], %s608_s28 }
 0x365   : > { %1150 = dma.done.wait (%p914_p5), %s618_s30, 128  }
 0x366   : > { %1152 = vsyncadd (%p914_p5), %s618_s30, 4294967168  ;;  %s28_s23 = sadd.s32 1, %s1175_s23   ;;  %s1557_s6 = sld [smem:[#allocation16_spill]] }
 0x367   : > { %p25_p7 = scmp.ge.s32.totalorder %s28_s23, 4   ;;  %s1558_s20 = sld [smem:[#allocation18_spill]] }
 0x368   : > { %s1559_s29 = sld [smem:[#allocation17_spill]]  ;;  %s1560_s18 = smov %s1159_s19 }
 0x369   : > { %s1562_s21 = smov %s1171_s22 }
 0x36a   :  { %27 = sbr.rel (!%p25_p7) target bundleno = 12 (0xc), region = 125 }
 0x36c   : > { %s1561_s19 = smov %s1557_s6 }
 0x36e   : > { %s1563_s22 = smov %s1559_s29 }
 0x36f   :  { %623 = vsyncpa [#allocation3], 1 }
 0x370   :  { %625 = vsyncpa [#allocation3 + $0x1], 1 }
 0x371   :  { %626 = vsyncpa [#allocation6], 1 }
 0x372   :  { %628 = vsyncpa [#allocation6 + $0x1], 1 }
 0x373   :  { %629 = vsyncpa [#allocation4], 1 }
 0x374   :  { %631 = vsyncpa [#allocation4 + $0x1], 1 }
 0x375   :  { %632 = vsyncpa [#allocation10], 1 }
 0x376   :  { %634 = vsyncpa [#allocation10 + $0x1], 1 }

</bundles_post_ra>
